<compile_context>
chip_gen: v6e
topology: v6e:2x2x1
jax: 0.10.0
libtpu: 0.0.40
codegen_flags: <defaults>
</compile_context>

<pallas_src>
import functools

import jax
import jax.numpy as jnp
from jax.experimental import pallas as pl
from jax.experimental.pallas import tpu as pltpu


def _round_up(x: int, m: int) -> int:
    return (x + m - 1) // m * m


def _pad_to(a, shape):
    pads = [(0, s - d) for d, s in zip(a.shape, shape)]
    if all(p == (0, 0) for p in pads):
        return a
    return jnp.pad(a, pads)


def _tpu_vmem_budget():
    """(soft budget, hard cap) bytes per core, by TPU generation."""
    kind = ""
    try:
        kind = jax.devices()[0].device_kind.lower()
    except Exception:
        pass
    if "v7" in kind:                    # 64 MiB physical VMEM per TensorCore
        return 44 << 20, 56 << 20
    return 96 << 20, 110 << 20          # v5e / v6e: 128 MiB physical VMEM


def mlp_kernel(x_ref, w1_ref, b1_ref, w2_ref, b2_ref, o_ref, acc_ref):
    """One (batch tile, hidden chunk) step of  y = relu(x@w1 + b1) @ w2 + b2."""
    j = pl.program_id(1)

    @pl.when(j == 0)
    def _init():
        acc_ref[...] = jnp.zeros_like(acc_ref)

    # fc1 chunk: [TB, D] @ [D, HC], f32 accumulation on the MXU.
    h = jnp.dot(x_ref[...], w1_ref[...], preferred_element_type=jnp.float32)
    # Bias + ReLU in f32.
    h = jnp.maximum(h + b1_ref[...], 0.0)
    # fc2 chunk accumulated in f32: [TB, HC] @ [HC, K].
    acc_ref[...] += jnp.dot(h.astype(w2_ref.dtype), w2_ref[...],
                            preferred_element_type=jnp.float32)

    # Single final store (keeps the vst slot off the critical path on v5e).
    @pl.when(j == pl.num_programs(1) - 1)
    def _finalize():
        o_ref[...] = (acc_ref[...] + b2_ref[...]).astype(o_ref.dtype)


def _plan_tiles(B, D, H, K, itemsize, budget):
    """Pick (TB, HC) so the true per-step VMEM footprint fits the budget."""
    sub = 16 if itemsize == 2 else 8        # bf16 sublane packing
    Hp = _round_up(H, 128)
    TB = min(512, _round_up(max(B, sub), sub))

    def footprint(tb, hc):
        f = 2 * tb * D * itemsize           # x tile, double-buffered
        f += 2 * (D * hc + hc) * itemsize   # w1 / b1 chunk, double-buffered
        f += 2 * (hc * K + K) * itemsize    # w2 / b2 chunk, double-buffered
        f += 2 * tb * K * itemsize          # output tile, double-buffered
        f += tb * K * 4                     # f32 accumulator scratch
        f += tb * hc * 4                    # fc1 intermediate (f32)
        if itemsize != 4:
            f += tb * hc * itemsize         # cast copy feeding the 2nd matmul
        return f

    # Largest hidden chunk (multiple of 128 that divides Hp) within budget.
    m = Hp // 128
    divisors = sorted((d * 128 for d in range(1, m + 1) if m % d == 0),
                      reverse=True)
    HC = 128
    for c in divisors:
        if footprint(TB, c) <= budget:
            HC = c
            break

    # Last resort: shrink the batch tile, preferring to stay >= 256 (MXU width).
    if footprint(TB, HC) > budget:
        floor = 256 if TB >= 256 else sub
        while TB > floor and footprint(TB, HC) > budget:
            TB = max(floor, _round_up(TB // 2, sub))
        while TB > sub and footprint(TB, HC) > budget:
            TB = max(sub, _round_up(TB // 2, sub))

    return TB, HC, Hp, footprint(TB, HC)


@functools.partial(jax.jit, static_argnames=("compute_dtype",))
def network_exploration_forward(x, w1, b1, w2, b2, compute_dtype=None):
    """x:[B,D], w1:[D,H], b1:[1,H], w2:[H,K], b2:[1,K] -> [B,K]."""
    B, D = x.shape
    H = w1.shape[1]
    K = w2.shape[1]
    out_dtype = x.dtype

    cdt = jnp.dtype(compute_dtype) if compute_dtype is not None else jnp.dtype(x.dtype)
    itemsize = cdt.itemsize

    budget, hard_cap = _tpu_vmem_budget()
    TB, HC, Hp, footprint = _plan_tiles(B, D, H, K, itemsize, budget)
    nb = (B + TB - 1) // TB
    nh = Hp // HC

    # Optional fast-math cast (bf16 MXU on v6e/v7x); accumulation stays f32.
    x = x.astype(cdt)
    w1 = w1.astype(cdt)
    b1 = b1.astype(cdt)
    w2 = w2.astype(cdt)
    b2 = b2.astype(cdt)

    # Only the weights are padded (one-off, cheap) so the hidden dim tiles
    # cleanly; the zero pad is exact.  x / output stay unpadded.
    w1p = _pad_to(w1, (D, Hp))
    b1p = _pad_to(b1, (1, Hp))
    w2p = _pad_to(w2, (Hp, K))

    vmem_limit = int(min(max(footprint + (2 << 20), 16 << 20), hard_cap))

    flops = 2 * B * (D * Hp + Hp * K)
    bytes_accessed = ((B * D + B * K) * jnp.dtype(out_dtype).itemsize
                      + nb * (D * Hp + Hp + Hp * K + K) * itemsize)
    cost = pl.CostEstimate(flops=flops, transcendentals=0,
                           bytes_accessed=bytes_accessed)

    return pl.pallas_call(
        mlp_kernel,
        out_shape=jax.ShapeDtypeStruct((B, K), out_dtype),
        grid=(nb, nh),
        in_specs=[
            pl.BlockSpec((TB, D), lambda i, j: (i, 0)),   # x: streams over batch
            pl.BlockSpec((D, HC), lambda i, j: (0, j)),   # w1 hidden chunk
            pl.BlockSpec((1, HC), lambda i, j: (0, j)),   # b1 hidden chunk
            pl.BlockSpec((HC, K), lambda i, j: (j, 0)),   # w2 hidden chunk
            pl.BlockSpec((1, K), lambda i, j: (0, 0)),    # b2 (resident)
        ],
        out_specs=pl.BlockSpec((TB, K), lambda i, j: (i, 0)),
        scratch_shapes=[pltpu.VMEM((TB, K), jnp.float32)],
        compiler_params=pltpu.CompilerParams(
            dimension_semantics=("parallel", "arbitrary"),
            vmem_limit_bytes=vmem_limit,
        ),
        cost_estimate=cost,
    )(x, w1p, b1p, w2p, b2)


def init_params(key, dim, hidden_size, k, dtype=jnp.float32):
    """Deterministic init mimicking nn.Linear defaults (uniform +/- 1/sqrt(fan_in))."""
    k1, k2, k3, k4 = jax.random.split(key, 4)
    lim1 = 1.0 / jnp.sqrt(jnp.array(dim, dtype))
    lim2 = 1.0 / jnp.sqrt(jnp.array(hidden_size, dtype))
    # Stored pre-transposed: [in, out]
    w1 = jax.random.uniform(k1, (dim, hidden_size), dtype, -lim1, lim1)
    b1 = jax.random.uniform(k2, (1, hidden_size), dtype, -lim1, lim1)
    w2 = jax.random.uniform(k3, (hidden_size, k), dtype, -lim2, lim2)
    b2 = jax.random.uniform(k4, (1, k), dtype, -lim2, lim2)
    return w1, b1, w2, b2


if __name__ == "__main__":
    # Small shapes consistent with the module defaults: batch=8, dim=16,
    # hidden_size=100, k=10.
    B, D, H, K = 8, 16, 100, 10
    key = jax.random.PRNGKey(0)
    kx, kp = jax.random.split(key)
    x = jax.random.normal(kx, (B, D), jnp.float32)
    w1, b1, w2, b2 = init_params(kp, D, H, K)

    ref = jnp.maximum(x @ w1 + b1, 0.0) @ w2 + b2

    # f32 path (numerically faithful to the PyTorch module).
    out = jax.block_until_ready(network_exploration_forward(x, w1, b1, w2, b2))
    assert out.shape == (B, K)
    assert jnp.allclose(out, ref, atol=1e-5, rtol=1e-5)

    # bf16 compute path (the v6e/v7x fast path: bf16 MXU inputs, f32 accumulate).
    out_bf16 = jax.block_until_ready(
        network_exploration_forward(x, w1, b1, w2, b2, compute_dtype=jnp.bfloat16))
    assert out_bf16.shape == (B, K)
    assert jnp.allclose(out_bf16, ref, atol=5e-2, rtol=5e-2)

    print("KERNEL_OK")
</pallas_src>

<mosaic_0001>
module attributes {stable_mosaic.version = 11 : i64} {
  func.func @mlp_kernel(%arg0: i32, %arg1: i32, %arg2: memref<8x16xf32, #tpu.memory_space<vmem>>, %arg3: memref<16x128xf32, #tpu.memory_space<vmem>>, %arg4: memref<1x128xf32, #tpu.memory_space<vmem>>, %arg5: memref<128x10xf32, #tpu.memory_space<vmem>>, %arg6: memref<1x10xf32, #tpu.memory_space<vmem>>, %arg7: memref<8x10xf32, #tpu.memory_space<vmem>>, %arg8: memref<8x10xf32, #tpu.memory_space<vmem>>) attributes {dimension_semantics = [#tpu.dimension_semantics<parallel>, #tpu.dimension_semantics<arbitrary>], iteration_bounds = array<i64: 1, 1>, scalar_prefetch = 0 : i64, scratch_operands = 1 : i64, tpu.core_type = #tpu.core_type<tc>, window_params = [{transform_indices = @transform_0, window_bounds = array<i64: 8, 16>}, {transform_indices = @transform_1, window_bounds = array<i64: 16, 128>}, {transform_indices = @transform_2, window_bounds = array<i64: 1, 128>}, {transform_indices = @transform_3, window_bounds = array<i64: 128, 10>}, {pipeline_mode = #tpu.pipeline_mode<synchronous>, transform_indices = @transform_4, window_bounds = array<i64: 1, 10>}, {transform_indices = @transform_5, window_bounds = array<i64: 8, 10>}]} {
    %c0_i32 = arith.constant 0 : i32
    %0 = arith.cmpi eq, %arg1, %c0_i32 : i32
    %1 = arith.extui %0 : i1 to i32
    %c0_i32_0 = arith.constant 0 : i32
    %2 = arith.cmpi ne, %1, %c0_i32_0 : i32
    scf.if %2 {
      %cst_16 = arith.constant 0.000000e+00 : f32
      %19 = vector.broadcast %cst_16 : f32 to vector<8x10xf32>
      %c0_17 = arith.constant 0 : index
      %c0_18 = arith.constant 0 : index
      %20 = vector.load %arg8[%c0_17, %c0_18] : memref<8x10xf32, #tpu.memory_space<vmem>>, vector<8x10xf32>
      tpu.vector_store %arg8[%c0_17, %c0_18], %19 {strides = array<i32>} : memref<8x10xf32, #tpu.memory_space<vmem>>, vector<8x10xf32>,
    } else {
    }
    %c0 = arith.constant 0 : index
    %c0_1 = arith.constant 0 : index
    %3 = vector.load %arg2[%c0, %c0_1] : memref<8x16xf32, #tpu.memory_space<vmem>>, vector<8x16xf32>
    %c0_2 = arith.constant 0 : index
    %c0_3 = arith.constant 0 : index
    %4 = vector.load %arg3[%c0_2, %c0_3] : memref<16x128xf32, #tpu.memory_space<vmem>>, vector<16x128xf32>
    %cst = arith.constant dense<0.000000e+00> : vector<8x128xf32>
    %5 = tpu.matmul %3, %4, %cst {dimension_numbers = #tpu.dot_dimension_numbers<[1], [0], [0], [1], [0, 0, 1, 1], [], []>} : vector<8x16xf32>, vector<16x128xf32>, vector<8x128xf32> -> vector<8x128xf32>
    %c0_4 = arith.constant 0 : index
    %c0_5 = arith.constant 0 : index
    %6 = vector.load %arg4[%c0_4, %c0_5] : memref<1x128xf32, #tpu.memory_space<vmem>>, vector<1x128xf32>
    %7 = vector.broadcast %6 : vector<1x128xf32> to vector<8x128xf32>
    %8 = arith.addf %5, %7 : vector<8x128xf32>
    %cst_6 = arith.constant 0.000000e+00 : f32
    %9 = vector.broadcast %cst_6 : f32 to vector<8x128xf32>
    %10 = arith.maximumf %8, %9 : vector<8x128xf32>
    %c0_7 = arith.constant 0 : index
    %c0_8 = arith.constant 0 : index
    %11 = vector.load %arg8[%c0_7, %c0_8] : memref<8x10xf32, #tpu.memory_space<vmem>>, vector<8x10xf32>
    %c0_9 = arith.constant 0 : index
    %c0_10 = arith.constant 0 : index
    %12 = vector.load %arg5[%c0_9, %c0_10] : memref<128x10xf32, #tpu.memory_space<vmem>>, vector<128x10xf32>
    %cst_11 = arith.constant dense<0.000000e+00> : vector<8x10xf32>
    %13 = tpu.matmul %10, %12, %cst_11 {dimension_numbers = #tpu.dot_dimension_numbers<[1], [0], [0], [1], [0, 0, 1, 1], [], []>} : vector<8x128xf32>, vector<128x10xf32>, vector<8x10xf32> -> vector<8x10xf32>
    %14 = arith.addf %11, %13 : vector<8x10xf32>
    %c0_12 = arith.constant 0 : index
    %c0_13 = arith.constant 0 : index
    %15 = vector.load %arg8[%c0_12, %c0_13] : memref<8x10xf32, #tpu.memory_space<vmem>>, vector<8x10xf32>
    tpu.vector_store %arg8[%c0_12, %c0_13], %14 {strides = array<i32>} : memref<8x10xf32, #tpu.memory_space<vmem>>, vector<8x10xf32>,
    %c0_i32_14 = arith.constant 0 : i32
    %16 = arith.cmpi eq, %arg1, %c0_i32_14 : i32
    %17 = arith.extui %16 : i1 to i32
    %c0_i32_15 = arith.constant 0 : i32
    %18 = arith.cmpi ne, %17, %c0_i32_15 : i32
    scf.if %18 {
      %c0_16 = arith.constant 0 : index
      %c0_17 = arith.constant 0 : index
      %19 = vector.load %arg8[%c0_16, %c0_17] : memref<8x10xf32, #tpu.memory_space<vmem>>, vector<8x10xf32>
      %c0_18 = arith.constant 0 : index
      %c0_19 = arith.constant 0 : index
      %20 = vector.load %arg6[%c0_18, %c0_19] : memref<1x10xf32, #tpu.memory_space<vmem>>, vector<1x10xf32>
      %21 = vector.broadcast %20 : vector<1x10xf32> to vector<8x10xf32>
      %22 = arith.addf %19, %21 : vector<8x10xf32>
      %c0_20 = arith.constant 0 : index
      %c0_21 = arith.constant 0 : index
      %23 = vector.load %arg7[%c0_20, %c0_21] : memref<8x10xf32, #tpu.memory_space<vmem>>, vector<8x10xf32>
      tpu.vector_store %arg7[%c0_20, %c0_21], %22 {strides = array<i32>} : memref<8x10xf32, #tpu.memory_space<vmem>>, vector<8x10xf32>,
    } else {
    }
    return
  }
  func.func @transform_0(%arg0: i32, %arg1: i32) -> (i32, i32) {
    %c0_i32 = arith.constant 0 : i32
    %c0_i32_0 = arith.constant 0 : i32
    return %arg0, %c0_i32 : i32, i32
  }
  func.func @transform_1(%arg0: i32, %arg1: i32) -> (i32, i32) {
    %c0_i32 = arith.constant 0 : i32
    %c0_i32_0 = arith.constant 0 : i32
    return %c0_i32, %arg1 : i32, i32
  }
  func.func @transform_2(%arg0: i32, %arg1: i32) -> (i32, i32) {
    %c0_i32 = arith.constant 0 : i32
    %c0_i32_0 = arith.constant 0 : i32
    return %c0_i32, %arg1 : i32, i32
  }
  func.func @transform_3(%arg0: i32, %arg1: i32) -> (i32, i32) {
    %c0_i32 = arith.constant 0 : i32
    %c0_i32_0 = arith.constant 0 : i32
    return %arg1, %c0_i32 : i32, i32
  }
  func.func @transform_4(%arg0: i32, %arg1: i32) -> (i32, i32) {
    %c0_i32 = arith.constant 0 : i32
    %c0_i32_0 = arith.constant 0 : i32
    %c0_i32_1 = arith.constant 0 : i32
    return %c0_i32, %c0_i32_0 : i32, i32
  }
  func.func @transform_5(%arg0: i32, %arg1: i32) -> (i32, i32) {
    %c0_i32 = arith.constant 0 : i32
    %c0_i32_0 = arith.constant 0 : i32
    return %arg0, %c0_i32 : i32, i32
  }
}

</mosaic_0001>

<bundles_post_ra>
// kernel: network_exploration_forward.1
= control target key start
LH: loop header
LB: loop body
LE: loop exit
PB: predicated region body
PF: predicated region fallthrough
CT: control target
= control target key end

     0   :  { %v319_v1 = vmov 0.0   ;;  %vm320_vm0 = vmmov 0   ;;  %vm37_vm1 = vcmask 130048   ;;  %s423_s0 = inlined_call_operand.vmem [shape: f32[8,16], index: 0, kind: input, shape index: {}]   ;;  %s424_s1 = inlined_call_operand.vmem [shape: f32[16,128], index: 1, kind: input, shape index: {}]   ;;  %s425_s2 = inlined_call_operand.vmem [shape: f32[1,128], index: 2, kind: input, shape index: {}]   ;;  %s426_s3 = inlined_call_operand.vmem [shape: f32[128,10], index: 3, kind: input, shape index: {}]   ;;  %s427_s4 = inlined_call_operand.vmem [shape: f32[1,10], index: 4, kind: input, shape index: {}]   ;;  %s428_s5 = inlined_call_operand.hbm [shape: f32[8,10], index: 5, kind: output, shape index: {}]  }
   0x1   :  { %v29_v0 = vld [vmem:[%s424_s1 + $0x8] sm:$0xff]  ;;  %252 = vmatprep.subr.mxu0 %v319_v1  ;;  %v28_v2 = vld [vmem:[%s424_s1] sm:$0xff]  ;;  %256 = vmatprep.mubr.msk.f32.mxu0 %vm320_vm0, %v319_v1  ;;  %v128_v3 = vld [vmem:[%s426_s3 + $0x78] sm:$0xff] }
   0x2   :  { %253 = vmatpush3.msra.mxu0 %v29_v0  ;;  %v27_v4 = vld [vmem:[%s423_s0] sm:$0xff]  ;;  %259 = vmatprep.subr.mxu1 %v319_v1  ;;  %v127_v5 = vld [vmem:[%s426_s3 + $0x70] sm:$0xff]  ;;  %v126_v6 = vld [vmem:[%s426_s3 + $0x68] sm:$0xff] }
   0x3   :  { %254 = vmatprep.subr.mxu0 %v319_v1  ;;  %260 = vmatpush3.msra.mxu1 %v128_v3 }
   0x4   :  { %255 = vmatpush3.msra.mxu0 %v28_v2  ;;  %261 = vmatprep.subr.mxu1 %v319_v1 }
   0x5   :  { %257 = vmatmul.mubr.msk.f32.vlgmr.msra.gmra.mxu0 %vm37_vm1, %v27_v4  ;;  %262 = vmatpush3.msra.mxu1 %v127_v5 }
   0x6   :  { %10 = vsyncpa [#allocation4], 0  ;;  %263 = vmatprep.subr.mxu1 %v319_v1  ;;  %v125_v7 = vld [vmem:[%s426_s3 + $0x60] sm:$0xff]  ;;  %291 = vmatprep.mubr.msk.f32.mxu1 %vm320_vm0, %v319_v1  ;;  %v124_v8 = vld [vmem:[%s426_s3 + $0x58] sm:$0xff]  ;;  %vm25_vm2 = vcmask 80896   ;;  %s321_s30 = smov [#allocation3]  }
   0x7   :  { %264 = vmatpush3.msra.mxu1 %v126_v6  ;;  %v123_v9 = vld [vmem:[%s426_s3 + $0x50] sm:$0xff]  ;;  %v122_v10 = vld [vmem:[%s426_s3 + $0x48] sm:$0xff]  ;;  %v121_v11 = vld [vmem:[%s426_s3 + $0x40] sm:$0xff]  ;;  %26 = vst.msk [vmem:[#allocation2] sm:$0xff] %vm25_vm2, %v319_v1  ;;  %s221_s6 = sshll.u32 %s321_s30, 4  ;;  %s222_s6 = int_to_ptr.vmem [resolvable:$true] %s221_s6 }
   0x8   :  { %265 = vmatprep.subr.mxu1 %v319_v1  ;;  %v120_v12 = vld [vmem:[%s426_s3 + $0x38] sm:$0xff]  ;;  %v119_v13 = vld [vmem:[%s426_s3 + $0x30] sm:$0xff]  ;;  %v118_v14 = vld [vmem:[%s426_s3 + $0x28] sm:$0xff]  ;;  %p302_p1 = scmp.lt.s32.totalorder %s222_s6, %s222_s6 }
   0x9   :  { %266 = vmatpush3.msra.mxu1 %v125_v7  ;;  %v117_v15 = vld [vmem:[%s426_s3 + $0x20] sm:$0xff]  ;;  %v116_v16 = vld [vmem:[%s426_s3 + $0x18] sm:$0xff]  ;;  %v115_v17 = vld [vmem:[%s426_s3 + $0x10] sm:$0xff] }
   0xa   :  { %267 = vmatprep.subr.mxu1 %v319_v1  ;;  %v114_v18 = vld [vmem:[%s426_s3 + $0x8] sm:$0xff]  ;;  %v113_v19 = vld [vmem:[%s426_s3] sm:$0xff] }
   0xb   :  { %268 = vmatpush3.msra.mxu1 %v124_v8  ;;  %v229_v20 = vld [vmem:[%s425_s2] ss:$0 sm:$0xff]  ;;  %s297_s2 = scalar_lea.vmem %s222_s6, 128 }
   0xc   :  { %269 = vmatprep.subr.mxu1 %v319_v1  ;;  %v231_v29 = vld [vmem:[%s427_s4] ss:$0 sm:$0xff]  ;;  %p298_p0 = scmp.ne.s32.totalorder %s222_s6, %s297_s2  ;;  %p303_p2 = scmp.lt.s32.totalorder %s297_s2, %s297_s2 }
   0xd   :  { %270 = vmatpush3.msra.mxu1 %v123_v9 }
   0xe   :  { %271 = vmatprep.subr.mxu1 %v319_v1  ;;  %v112_v25 = vld [vmem:[#allocation2] sm:$0xff]  ;;  %p304_p3 = por %p303_p2, %p302_p1 }
   0xf   :  { %272 = vmatpush3.msra.mxu1 %v122_v10 }
  0x10   :  { %273 = vmatprep.subr.mxu1 %v319_v1  ;;  %p305_p4 = pnand %p304_p3, %p298_p0 }
  0x11   :  { %274 = vmatpush3.msra.mxu1 %v121_v11 }
  0x12   :  { %275 = vmatprep.subr.mxu1 %v319_v1 }
  0x13   :  { %276 = vmatpush3.msra.mxu1 %v120_v12 }
  0x14   :  { %277 = vmatprep.subr.mxu1 %v319_v1 }
  0x15   :  { %278 = vmatpush3.msra.mxu1 %v119_v13 }
  0x16   :  { %279 = vmatprep.subr.mxu1 %v319_v1 }
  0x17   :  { %280 = vmatpush3.msra.mxu1 %v118_v14 }
  0x18   :  { %281 = vmatprep.subr.mxu1 %v319_v1 }
  0x19   :  { %282 = vmatpush3.msra.mxu1 %v117_v15 }
  0x1a   :  { %283 = vmatprep.subr.mxu1 %v319_v1 }
  0x1b   :  { %284 = vmatpush3.msra.mxu1 %v116_v16 }
  0x1c   :  { %285 = vmatprep.subr.mxu1 %v319_v1 }
  0x1d   :  { %286 = vmatpush3.msra.mxu1 %v115_v17 }
  0x1e   :  { %287 = vmatprep.subr.mxu1 %v319_v1 }
  0x1f   :  { %288 = vmatpush3.msra.mxu1 %v114_v18 }
  0x20   :  { %289 = vmatprep.subr.mxu1 %v319_v1 }
  0x21   :  { %290 = vmatpush3.msra.mxu1 %v113_v19 }
  0xc5   :  { %v107_v21 = vpop.f32.mrf.mxu0 }
  0xc6   :  { %v108_v22 = vadd.f32 %v229_v20, %v107_v21 }
  0xc7   :  { %v258_v23 = vpop.f32.mrf.mxu0 }
  0xc8   :  { %v111_v24 = vmax.f32 %v108_v22, 0.0 }
  0xca   :  { %292 = vmatmul.mubr.f32.vlgmr.msra.gmra.mxu1 %v111_v24 }
 0x18a   :  { %v195_v26 = vpop.f32.mrf.mxu1 }
 0x18b   :  { %v199_v27 = vadd.f32 %v195_v26, %v112_v25 }
 0x18c   :  { %v293_v28 = vpop.f32.mrf.mxu1 }
 0x18d   :  { %201 = vst.msk [vmem:[#allocation2] sm:$0xff] %vm25_vm2, %v199_v27 }
 0x194   :  { %v205_v30 = vld [vmem:[#allocation2] sm:$0xff] }
 0x195   :  { %v213_v31 = vadd.f32 %v231_v29, %v205_v30 }
 0x197   :  { %214 = vst.msk [vmem:[#allocation3] sm:$0xff] %vm25_vm2, %v213_v31 }
 0x198   :  { %308 = shalt.err (!%p305_p4)
}
 0x199   :  { %224 = dma.vmem_to_hbm [thread:$0]  %s222_s6, 128, %s428_s5, [#allocation4]  }
 0x19a   :  { %317 = dma.done.wait [#allocation4], 128  }
 0x19b   :  { %318 = vsyncadd [#allocation4], 4294967168 }
 0x19c   :  { %228 = vsyncpa [#allocation4], 1 }

</bundles_post_ra>
